<compile_context>
chip_gen: v5e
topology: v5e:2x2
jax: 0.10.0
libtpu: 0.0.40
codegen_flags: <defaults>
</compile_context>

<pallas_src>
import functools

import jax
import jax.numpy as jnp
from jax.experimental import pallas as pl
from jax.experimental.pallas import tpu as pltpu

LANE = 128     # lane width (last dim)
SUBLANE = 8    # f32 sublane width (second-to-last dim)


def _round_up(n: int, m: int) -> int:
    return ((n + m - 1) // m) * m


def _fused_mlp_kernel(*refs, n_layers: int):
    """Fused MLP: y = Ln(ReLU(...ReLU(L1(x))...)), no ReLU after last layer.

    refs layout: (x_ref, w1_ref, b1_ref, ..., wN_ref, bN_ref, o_ref)
      x_ref: [TILE_B, D0_pad]      VMEM
      wi:    [Di-1_pad, Di_pad]    VMEM (PyTorch weight transposed + zero-padded)
      bi:    [1, Di_pad]           VMEM (zero in padded lanes)
      o_ref: [TILE_B, DN_pad]      VMEM
    """
    x_ref = refs[0]
    o_ref = refs[-1]
    y = x_ref[...]
    for li in range(n_layers):
        w_ref = refs[1 + 2 * li]
        b_ref = refs[2 + 2 * li]
        y = jnp.dot(y, w_ref[...], preferred_element_type=jnp.float32)
        y = y + b_ref[...]               # bias broadcast over batch (VPU slack)
        if li < n_layers - 1:
            y = jnp.maximum(y, 0.0)      # ReLU between layers only
    o_ref[...] = y.astype(o_ref.dtype)


def neural_head_forward(params, u_vect):
    """Forward pass of NeuralHead (GRL is identity in forward).

    params: list of (w_t [in, out], b [1, out]) in un-padded (PyTorch) sizes.
    u_vect: [B, start_neurons]
    returns: [B, num_classes]
    """
    n_layers = len(params)
    dims = [params[0][0].shape[0]] + [w.shape[1] for w, _ in params]
    pdims = [_round_up(d, LANE) for d in dims]

    B = u_vect.shape[0]
    # Single grid point for small batches; tile (multiple of 8 sublanes) for big ones.
    TILE_B = min(_round_up(B, SUBLANE), 256)
    B_pad = _round_up(B, TILE_B)

    # Zero-pad activations and parameters to lane-dense shapes.
    x_p = jnp.zeros((B_pad, pdims[0]), u_vect.dtype).at[:B, : dims[0]].set(u_vect)
    padded_args = []
    for li, (w_t, b) in enumerate(params):
        w_p = (
            jnp.zeros((pdims[li], pdims[li + 1]), w_t.dtype)
            .at[: dims[li], : dims[li + 1]]
            .set(w_t)
        )
        b_p = (
            jnp.zeros((1, pdims[li + 1]), w_t.dtype)
            .at[:, : dims[li + 1]]
            .set(jnp.reshape(b, (1, -1)))
        )
        padded_args += [w_p, b_p]

    grid = (B_pad // TILE_B,)

    in_specs = [pl.BlockSpec((TILE_B, pdims[0]), lambda i: (i, 0))]
    for li in range(n_layers):
        # Weights/biases: full block, resident across the whole batch grid.
        in_specs.append(pl.BlockSpec((pdims[li], pdims[li + 1]), lambda i: (0, 0)))
        in_specs.append(pl.BlockSpec((1, pdims[li + 1]), lambda i: (0, 0)))
    out_spec = pl.BlockSpec((TILE_B, pdims[-1]), lambda i: (i, 0))

    kernel = functools.partial(_fused_mlp_kernel, n_layers=n_layers)
    out_p = pl.pallas_call(
        kernel,
        out_shape=jax.ShapeDtypeStruct((B_pad, pdims[-1]), u_vect.dtype),
        grid=grid,
        in_specs=in_specs,
        out_specs=out_spec,
        compiler_params=pltpu.CompilerParams(
            dimension_semantics=("parallel",),  # v7x: split batch across TCs
        ),
    )(x_p, *padded_args)

    # Slice away batch padding AND padded (zero) logits before any argmax.
    return out_p[:B, : dims[-1]]


def init_neural_head_params(key, layers_config):
    """Xavier-normal init with ReLU gain (sqrt(2)), bias = 0.01, matching the
    PyTorch module's __init__. Weights are stored transposed: [in, out]."""
    relu_gain = jnp.sqrt(2.0)
    params = []
    for i in range(1, len(layers_config)):
        fan_in, fan_out = layers_config[i - 1], layers_config[i]
        key, sub = jax.random.split(key)
        std = relu_gain * jnp.sqrt(2.0 / (fan_in + fan_out))
        w_t = (std * jax.random.normal(sub, (fan_in, fan_out))).astype(jnp.float32)
        b = jnp.full((1, fan_out), 0.01, dtype=jnp.float32)
        params.append((w_t, b))
    return params


def neural_head_forward_ref(params, u_vect):
    """Pure-JAX reference for correctness checking."""
    x = u_vect
    n = len(params)
    for i, (w_t, b) in enumerate(params):
        x = x @ w_t + jnp.reshape(b, (1, -1))
        if i < n - 1:
            x = jnp.maximum(x, 0.0)
    return x


if __name__ == "__main__":
    key = jax.random.PRNGKey(0)
    layers_config = [32, 64, 48, 8]   # start_neurons ... output classes
    batch_size = 2

    k_param, k_x = jax.random.split(key)
    params = init_neural_head_params(k_param, layers_config)
    u_vect = jax.random.normal(k_x, (batch_size, layers_config[0]), dtype=jnp.float32)

    fwd = jax.jit(neural_head_forward)
    out = fwd(params, u_vect)
    out = jax.block_until_ready(out)

    ref = neural_head_forward_ref(params, u_vect)
    assert out.shape == (batch_size, layers_config[-1])
    assert jnp.allclose(out, ref, atol=1e-5, rtol=1e-5), "mismatch vs reference"

    # predict() equivalent (argmax over the TRUE class logits only).
    _ = jnp.argmax(out, axis=1)

    print("KERNEL_OK")
</pallas_src>

<mosaic_0001>
module attributes {stable_mosaic.version = 11 : i64} {
  func.func @_fused_mlp_kernel(%arg0: i32, %arg1: memref<8x128xf32, #tpu.memory_space<vmem>>, %arg2: memref<128x128xf32, #tpu.memory_space<vmem>>, %arg3: memref<1x128xf32, #tpu.memory_space<vmem>>, %arg4: memref<128x128xf32, #tpu.memory_space<vmem>>, %arg5: memref<1x128xf32, #tpu.memory_space<vmem>>, %arg6: memref<128x128xf32, #tpu.memory_space<vmem>>, %arg7: memref<1x128xf32, #tpu.memory_space<vmem>>, %arg8: memref<8x128xf32, #tpu.memory_space<vmem>>) attributes {dimension_semantics = [#tpu.dimension_semantics<parallel>], iteration_bounds = array<i64: 1>, scalar_prefetch = 0 : i64, scratch_operands = 0 : i64, tpu.core_type = #tpu.core_type<tc>, window_params = [{transform_indices = @transform_0, window_bounds = array<i64: 8, 128>}, {pipeline_mode = #tpu.pipeline_mode<synchronous>, transform_indices = @transform_1, window_bounds = array<i64: 128, 128>}, {pipeline_mode = #tpu.pipeline_mode<synchronous>, transform_indices = @transform_2, window_bounds = array<i64: 1, 128>}, {pipeline_mode = #tpu.pipeline_mode<synchronous>, transform_indices = @transform_3, window_bounds = array<i64: 128, 128>}, {pipeline_mode = #tpu.pipeline_mode<synchronous>, transform_indices = @transform_4, window_bounds = array<i64: 1, 128>}, {pipeline_mode = #tpu.pipeline_mode<synchronous>, transform_indices = @transform_5, window_bounds = array<i64: 128, 128>}, {pipeline_mode = #tpu.pipeline_mode<synchronous>, transform_indices = @transform_6, window_bounds = array<i64: 1, 128>}, {transform_indices = @transform_7, window_bounds = array<i64: 8, 128>}]} {
    %c0 = arith.constant 0 : index
    %c0_0 = arith.constant 0 : index
    %0 = vector.load %arg1[%c0, %c0_0] : memref<8x128xf32, #tpu.memory_space<vmem>>, vector<8x128xf32>
    %c0_1 = arith.constant 0 : index
    %c0_2 = arith.constant 0 : index
    %1 = vector.load %arg2[%c0_1, %c0_2] : memref<128x128xf32, #tpu.memory_space<vmem>>, vector<128x128xf32>
    %cst = arith.constant dense<0.000000e+00> : vector<8x128xf32>
    %2 = tpu.matmul %0, %1, %cst {dimension_numbers = #tpu.dot_dimension_numbers<[1], [0], [0], [1], [0, 0, 1, 1], [], []>} : vector<8x128xf32>, vector<128x128xf32>, vector<8x128xf32> -> vector<8x128xf32>
    %c0_3 = arith.constant 0 : index
    %c0_4 = arith.constant 0 : index
    %3 = vector.load %arg3[%c0_3, %c0_4] : memref<1x128xf32, #tpu.memory_space<vmem>>, vector<1x128xf32>
    %4 = vector.broadcast %3 : vector<1x128xf32> to vector<8x128xf32>
    %5 = arith.addf %2, %4 : vector<8x128xf32>
    %cst_5 = arith.constant 0.000000e+00 : f32
    %6 = vector.broadcast %cst_5 : f32 to vector<8x128xf32>
    %7 = arith.maximumf %5, %6 : vector<8x128xf32>
    %c0_6 = arith.constant 0 : index
    %c0_7 = arith.constant 0 : index
    %8 = vector.load %arg4[%c0_6, %c0_7] : memref<128x128xf32, #tpu.memory_space<vmem>>, vector<128x128xf32>
    %cst_8 = arith.constant dense<0.000000e+00> : vector<8x128xf32>
    %9 = tpu.matmul %7, %8, %cst_8 {dimension_numbers = #tpu.dot_dimension_numbers<[1], [0], [0], [1], [0, 0, 1, 1], [], []>} : vector<8x128xf32>, vector<128x128xf32>, vector<8x128xf32> -> vector<8x128xf32>
    %c0_9 = arith.constant 0 : index
    %c0_10 = arith.constant 0 : index
    %10 = vector.load %arg5[%c0_9, %c0_10] : memref<1x128xf32, #tpu.memory_space<vmem>>, vector<1x128xf32>
    %11 = vector.broadcast %10 : vector<1x128xf32> to vector<8x128xf32>
    %12 = arith.addf %9, %11 : vector<8x128xf32>
    %cst_11 = arith.constant 0.000000e+00 : f32
    %13 = vector.broadcast %cst_11 : f32 to vector<8x128xf32>
    %14 = arith.maximumf %12, %13 : vector<8x128xf32>
    %c0_12 = arith.constant 0 : index
    %c0_13 = arith.constant 0 : index
    %15 = vector.load %arg6[%c0_12, %c0_13] : memref<128x128xf32, #tpu.memory_space<vmem>>, vector<128x128xf32>
    %cst_14 = arith.constant dense<0.000000e+00> : vector<8x128xf32>
    %16 = tpu.matmul %14, %15, %cst_14 {dimension_numbers = #tpu.dot_dimension_numbers<[1], [0], [0], [1], [0, 0, 1, 1], [], []>} : vector<8x128xf32>, vector<128x128xf32>, vector<8x128xf32> -> vector<8x128xf32>
    %c0_15 = arith.constant 0 : index
    %c0_16 = arith.constant 0 : index
    %17 = vector.load %arg7[%c0_15, %c0_16] : memref<1x128xf32, #tpu.memory_space<vmem>>, vector<1x128xf32>
    %18 = vector.broadcast %17 : vector<1x128xf32> to vector<8x128xf32>
    %19 = arith.addf %16, %18 : vector<8x128xf32>
    %c0_17 = arith.constant 0 : index
    %c0_18 = arith.constant 0 : index
    %20 = vector.load %arg8[%c0_17, %c0_18] : memref<8x128xf32, #tpu.memory_space<vmem>>, vector<8x128xf32>
    tpu.vector_store %arg8[%c0_17, %c0_18], %19 {strides = array<i32>} : memref<8x128xf32, #tpu.memory_space<vmem>>, vector<8x128xf32>,
    return
  }
  func.func @transform_0(%arg0: i32) -> (i32, i32) {
    %c0_i32 = arith.constant 0 : i32
    %c0_i32_0 = arith.constant 0 : i32
    return %arg0, %c0_i32 : i32, i32
  }
  func.func @transform_1(%arg0: i32) -> (i32, i32) {
    %c0_i32 = arith.constant 0 : i32
    %c0_i32_0 = arith.constant 0 : i32
    %c0_i32_1 = arith.constant 0 : i32
    return %c0_i32, %c0_i32_0 : i32, i32
  }
  func.func @transform_2(%arg0: i32) -> (i32, i32) {
    %c0_i32 = arith.constant 0 : i32
    %c0_i32_0 = arith.constant 0 : i32
    %c0_i32_1 = arith.constant 0 : i32
    return %c0_i32, %c0_i32_0 : i32, i32
  }
  func.func @transform_3(%arg0: i32) -> (i32, i32) {
    %c0_i32 = arith.constant 0 : i32
    %c0_i32_0 = arith.constant 0 : i32
    %c0_i32_1 = arith.constant 0 : i32
    return %c0_i32, %c0_i32_0 : i32, i32
  }
  func.func @transform_4(%arg0: i32) -> (i32, i32) {
    %c0_i32 = arith.constant 0 : i32
    %c0_i32_0 = arith.constant 0 : i32
    %c0_i32_1 = arith.constant 0 : i32
    return %c0_i32, %c0_i32_0 : i32, i32
  }
  func.func @transform_5(%arg0: i32) -> (i32, i32) {
    %c0_i32 = arith.constant 0 : i32
    %c0_i32_0 = arith.constant 0 : i32
    %c0_i32_1 = arith.constant 0 : i32
    return %c0_i32, %c0_i32_0 : i32, i32
  }
  func.func @transform_6(%arg0: i32) -> (i32, i32) {
    %c0_i32 = arith.constant 0 : i32
    %c0_i32_0 = arith.constant 0 : i32
    %c0_i32_1 = arith.constant 0 : i32
    return %c0_i32, %c0_i32_0 : i32, i32
  }
  func.func @transform_7(%arg0: i32) -> (i32, i32) {
    %c0_i32 = arith.constant 0 : i32
    %c0_i32_0 = arith.constant 0 : i32
    return %arg0, %c0_i32 : i32, i32
  }
}

</mosaic_0001>

<bundles_post_ra>
// kernel: neural_head_forward.1
= control target key start
LH: loop header
LB: loop body
LE: loop exit
PB: predicated region body
PF: predicated region fallthrough
CT: control target
= control target key end

     0   :  { %s356_s1 = inlined_call_operand.vmem [shape: f32[128,128], index: 1, kind: input, shape index: {}]   ;;  %s357_s3 = inlined_call_operand.vmem [shape: f32[128,128], index: 3, kind: input, shape index: {}]   ;;  %s358_s2 = inlined_call_operand.vmem [shape: f32[1,128], index: 2, kind: input, shape index: {}]   ;;  %s359_s0 = inlined_call_operand.vmem [shape: f32[8,128], index: 0, kind: input, shape index: {}]   ;;  %s360_s4 = inlined_call_operand.vmem [shape: f32[1,128], index: 4, kind: input, shape index: {}]   ;;  %s361_s5 = inlined_call_operand.vmem [shape: f32[128,128], index: 5, kind: input, shape index: {}]   ;;  %s362_s6 = inlined_call_operand.vmem [shape: f32[1,128], index: 6, kind: input, shape index: {}]   ;;  %s363_s7 = inlined_call_operand.vmem [shape: f32[8,128], index: 7, kind: output, shape index: {}]  }
   0x1   :  { %v42_v0 = vld [vmem:[%s356_s1 + $0x78] sm:$0xff]  ;;  %v41_v1 = vld [vmem:[%s356_s1 + $0x70] sm:$0xff]  ;;  %v40_v2 = vld [vmem:[%s356_s1 + $0x68] sm:$0xff] }
   0x2   :  { %47 = vmatpush.msra.mxu0 %v42_v0  ;;  %v39_v3 = vld [vmem:[%s356_s1 + $0x60] sm:$0xff]  ;;  %v83_v4 = vld [vmem:[%s357_s3 + $0x78] sm:$0xff]  ;;  %v82_v6 = vld [vmem:[%s357_s3 + $0x70] sm:$0xff] }
   0x3   :  { %v38_v5 = vld [vmem:[%s356_s1 + $0x58] sm:$0xff]  ;;  %88 = vmatpush.msra.mxu1 %v83_v4  ;;  %v81_v7 = vld [vmem:[%s357_s3 + $0x68] sm:$0xff]  ;;  %v37_v8 = vld [vmem:[%s356_s1 + $0x50] sm:$0xff] }
   0x4   :  { %48 = vmatpush.msra.mxu0 %v41_v1  ;;  %v80_v9 = vld [vmem:[%s357_s3 + $0x60] sm:$0xff]  ;;  %v36_v10 = vld [vmem:[%s356_s1 + $0x48] sm:$0xff]  ;;  %v79_v11 = vld [vmem:[%s357_s3 + $0x58] sm:$0xff] }
   0x5   :  { %89 = vmatpush.msra.mxu1 %v82_v6  ;;  %v35_v12 = vld [vmem:[%s356_s1 + $0x40] sm:$0xff]  ;;  %v78_v13 = vld [vmem:[%s357_s3 + $0x50] sm:$0xff]  ;;  %v34_v14 = vld [vmem:[%s356_s1 + $0x38] sm:$0xff] }
   0x6   :  { %49 = vmatpush.msra.mxu0 %v40_v2  ;;  %v77_v15 = vld [vmem:[%s357_s3 + $0x48] sm:$0xff]  ;;  %v33_v16 = vld [vmem:[%s356_s1 + $0x30] sm:$0xff]  ;;  %v76_v17 = vld [vmem:[%s357_s3 + $0x40] sm:$0xff] }
   0x7   :  { %90 = vmatpush.msra.mxu1 %v81_v7  ;;  %v32_v18 = vld [vmem:[%s356_s1 + $0x28] sm:$0xff]  ;;  %v75_v19 = vld [vmem:[%s357_s3 + $0x38] sm:$0xff]  ;;  %v31_v20 = vld [vmem:[%s356_s1 + $0x20] sm:$0xff] }
   0x8   :  { %50 = vmatpush.msra.mxu0 %v39_v3  ;;  %v74_v21 = vld [vmem:[%s357_s3 + $0x30] sm:$0xff]  ;;  %v30_v22 = vld [vmem:[%s356_s1 + $0x18] sm:$0xff]  ;;  %v73_v23 = vld [vmem:[%s357_s3 + $0x28] sm:$0xff] }
   0x9   :  { %91 = vmatpush.msra.mxu1 %v80_v9  ;;  %v29_v24 = vld [vmem:[%s356_s1 + $0x10] sm:$0xff]  ;;  %v72_v25 = vld [vmem:[%s357_s3 + $0x20] sm:$0xff]  ;;  %v28_v26 = vld [vmem:[%s356_s1 + $0x8] sm:$0xff] }
   0xa   :  { %51 = vmatpush.msra.mxu0 %v38_v5  ;;  %v71_v27 = vld [vmem:[%s357_s3 + $0x18] sm:$0xff]  ;;  %v27_v28 = vld [vmem:[%s356_s1] sm:$0xff]  ;;  %v70_v30 = vld [vmem:[%s357_s3 + $0x10] sm:$0xff] }
   0xb   :  { %92 = vmatpush.msra.mxu1 %v79_v11  ;;  %v26_v29 = vld [vmem:[%s359_s0] sm:$0xff]  ;;  %v69_v31 = vld [vmem:[%s357_s3 + $0x8] sm:$0xff]  ;;  %v124_v33 = vld [vmem:[%s361_s5 + $0x78] sm:$0xff] }
   0xc   :  { %52 = vmatpush.msra.mxu0 %v37_v8  ;;  %v68_v32 = vld [vmem:[%s357_s3] sm:$0xff]  ;;  %v123_v34 = vld [vmem:[%s361_s5 + $0x70] sm:$0xff]  ;;  %129 = vmatpush.msra.mxu2 %v124_v33  ;;  %v122_v35 = vld [vmem:[%s361_s5 + $0x68] sm:$0xff] }
   0xd   :  { %93 = vmatpush.msra.mxu1 %v78_v13  ;;  %v121_v36 = vld [vmem:[%s361_s5 + $0x60] sm:$0xff]  ;;  %v120_v37 = vld [vmem:[%s361_s5 + $0x58] sm:$0xff]  ;;  %v119_v38 = vld [vmem:[%s361_s5 + $0x50] sm:$0xff] }
   0xe   :  { %53 = vmatpush.msra.mxu0 %v36_v10  ;;  %130 = vmatpush.msra.mxu2 %v123_v34  ;;  %v118_v39 = vld [vmem:[%s361_s5 + $0x48] sm:$0xff]  ;;  %v117_v40 = vld [vmem:[%s361_s5 + $0x40] sm:$0xff]  ;;  %v116_v41 = vld [vmem:[%s361_s5 + $0x38] sm:$0xff] }
   0xf   :  { %94 = vmatpush.msra.mxu1 %v77_v15  ;;  %v115_v42 = vld [vmem:[%s361_s5 + $0x30] sm:$0xff]  ;;  %v114_v43 = vld [vmem:[%s361_s5 + $0x28] sm:$0xff]  ;;  %v113_v44 = vld [vmem:[%s361_s5 + $0x20] sm:$0xff] }
  0x10   :  { %54 = vmatpush.msra.mxu0 %v35_v12  ;;  %131 = vmatpush.msra.mxu2 %v122_v35  ;;  %v112_v45 = vld [vmem:[%s361_s5 + $0x18] sm:$0xff]  ;;  %v154_v46 = vld [vmem:[%s358_s2] ss:$0 sm:$0xff]  ;;  %v111_v50 = vld [vmem:[%s361_s5 + $0x10] sm:$0xff] }
  0x11   :  { %95 = vmatpush.msra.mxu1 %v76_v17  ;;  %v110_v51 = vld [vmem:[%s361_s5 + $0x8] sm:$0xff]  ;;  %v109_v52 = vld [vmem:[%s361_s5] sm:$0xff] }
  0x12   :  { %55 = vmatpush.msra.mxu0 %v34_v14  ;;  %132 = vmatpush.msra.mxu2 %v121_v36  ;;  %v155_v53 = vld [vmem:[%s360_s4] ss:$0 sm:$0xff] }
  0x13   :  { %96 = vmatpush.msra.mxu1 %v75_v19  ;;  %v156_v57 = vld [vmem:[%s362_s6] ss:$0 sm:$0xff] }
  0x14   :  { %56 = vmatpush.msra.mxu0 %v33_v16  ;;  %133 = vmatpush.msra.mxu2 %v120_v37 }
  0x15   :  { %97 = vmatpush.msra.mxu1 %v74_v21 }
  0x16   :  { %57 = vmatpush.msra.mxu0 %v32_v18  ;;  %134 = vmatpush.msra.mxu2 %v119_v38 }
  0x17   :  { %98 = vmatpush.msra.mxu1 %v73_v23 }
  0x18   :  { %58 = vmatpush.msra.mxu0 %v31_v20  ;;  %135 = vmatpush.msra.mxu2 %v118_v39 }
  0x19   :  { %99 = vmatpush.msra.mxu1 %v72_v25 }
  0x1a   :  { %59 = vmatpush.msra.mxu0 %v30_v22  ;;  %136 = vmatpush.msra.mxu2 %v117_v40 }
  0x1b   :  { %100 = vmatpush.msra.mxu1 %v71_v27 }
  0x1c   :  { %60 = vmatpush.msra.mxu0 %v29_v24  ;;  %137 = vmatpush.msra.mxu2 %v116_v41 }
  0x1d   :  { %101 = vmatpush.msra.mxu1 %v70_v30 }
  0x1e   :  { %61 = vmatpush.msra.mxu0 %v28_v26  ;;  %138 = vmatpush.msra.mxu2 %v115_v42 }
  0x1f   :  { %102 = vmatpush.msra.mxu1 %v69_v31 }
  0x20   :  { %62 = vmatpush.msra.mxu0 %v27_v28  ;;  %139 = vmatpush.msra.mxu2 %v114_v43 }
  0x21   :  { %63 = vmatmul.f32.vlgmr.msra.gmra.mxu0 %v26_v29  ;;  %103 = vmatpush.msra.mxu1 %v68_v32 }
  0x22   :  { %140 = vmatpush.msra.mxu2 %v113_v44 }
  0x24   :  { %141 = vmatpush.msra.mxu2 %v112_v45 }
  0x26   :  { %142 = vmatpush.msra.mxu2 %v111_v50 }
  0x28   :  { %143 = vmatpush.msra.mxu2 %v110_v51 }
  0x2a   :  { %144 = vmatpush.msra.mxu2 %v109_v52 }
  0x9e   :  { %v64_v47 = vpop.f32.mrf.mxu0 }
  0x9f   :  { %v65_v48 = vadd.f32 %v154_v46, %v64_v47 }
  0xa1   :  { %v67_v49 = vmax.f32 %v65_v48, 0.0 }
  0xa3   :  { %104 = vmatmul.f32.vlgmr.msra.gmra.mxu1 %v67_v49 }
 0x120   :  { %v105_v54 = vpop.f32.mrf.mxu1 }
 0x121   :  { %v106_v55 = vadd.f32 %v155_v53, %v105_v54 }
 0x123   :  { %v108_v56 = vmax.f32 %v106_v55, 0.0 }
 0x125   :  { %145 = vmatmul.f32.vlgmr.msra.gmra.mxu2 %v108_v56 }
 0x1a8   :  { %v146_v58 = vpop.f32.mrf.mxu2 }
 0x1a9   :  { %v147_v59 = vadd.f32 %v156_v57, %v146_v58 }
 0x1ab   :  { %149 = vst [vmem:[%s363_s7] sm:$0xff] %v147_v59 }

</bundles_post_ra>
